<compile_context>
chip_gen: v6e
topology: v6e:2x2x1
jax: 0.10.0
libtpu: 0.0.40
codegen_flags: <defaults>
</compile_context>

<pallas_src>
import math
import numpy as np
import jax
import jax.numpy as jnp
from jax.experimental import pallas as pl
from jax.experimental.pallas import tpu as pltpu


def _make_kernel(T, K):
    """Kernel body specialized to frames-per-sample T and temporal kernel size K."""
    pad = (K - 1) // 2

    def kernel(x_ref, bg_ref, bgb_ref, bm_ref, bt_ref, ob_ref, o_ref):
        R = x_ref.shape[0]                       # N*T rows (samples stacked on the row axis)
        xs = x_ref[...]                          # (R, C*V) bf16, lane-dense

        # ---- unit_gcn: all subsets + down branch folded into one (C*V, O*V) operator ----
        y = jnp.dot(xs, bg_ref[...], preferred_element_type=jnp.float32) + bgb_ref[...]
        y = jnp.maximum(y, 0.0)                  # (R, O*V) f32
        y_bf = y.astype(jnp.bfloat16)

        # ---- center temporal tap + residual 1x1 conv fused into ONE MXU call ----
        # lanes = [ x (C*V) | y (O*V) ], operator rows stacked [B_res ; B_tcn_center]
        mid = jnp.concatenate([xs, y_bf], axis=1)                  # (R, C*V + O*V) bf16
        acc = jnp.dot(mid, bm_ref[...], preferred_element_type=jnp.float32)

        # ---- remaining temporal taps: roll (XLU) + boundary mask + accumulating dots ----
        row = jax.lax.broadcasted_iota(jnp.int32, (R, 1), 0)
        t_in = row % T                            # frame index within its own sample
        j = 0
        for k in range(K):
            d = k - pad
            if d == 0:
                continue
            shifted = pltpu.roll(y, (pad - k) % R, axis=0)         # shifted[r] = y[r + d] (circular)
            if d < 0:
                valid = t_in >= -d                # rows pulled from the previous sample -> 0
            else:
                valid = t_in < T - d              # rows pulled from the next sample -> 0
            shifted = jnp.where(valid, shifted, 0.0).astype(jnp.bfloat16)
            acc = acc + jnp.dot(shifted, bt_ref[j], preferred_element_type=jnp.float32)
            j += 1

        o_ref[...] = jnp.maximum(acc + ob_ref[...], 0.0)           # lane-dense (R, O*V) store

    return kernel


def fold_params(A, Wd, bd, bn1_s, bn1_b, Wdown, bdown, dbn_s, dbn_b,
                Wt, bt, tbn_s, tbn_b, Wr, br, rbn_s, rbn_b):
    """Weight-only folding of BN affine, conv biases and the L2-normalized adjacency into
    lane-dense bf16 operators.  Static at inference -> hoist/cache outside the per-call path."""
    hp = jax.lax.Precision.HIGHEST
    S, V, _ = A.shape
    O, C = Wdown.shape
    K = Wt.shape[0]
    pad = (K - 1) // 2
    eye = jnp.eye(V, dtype=jnp.float32)

    # adaptive adjacency column-wise L2 normalization (batch independent -> hoisted)
    An = A / (jnp.sqrt(jnp.sum(A * A, axis=1, keepdims=True)) + 0.0001)

    s1, t1 = bn1_s[:, 0], bn1_b[:, 0]
    sd, td = dbn_s[:, 0], dbn_b[:, 0]
    st, tt = tbn_s[:, 0], tbn_b[:, 0]
    sr, tr = rbn_s[:, 0], rbn_b[:, 0]

    # gcn main branch (all S subsets) + down branch -> one (C*V, O*V) operator
    B_gcn = jnp.einsum('o,soc,suv->cuov', s1, Wd, An, precision=hp)
    B_gcn = B_gcn + jnp.einsum('o,oc,uv->cuov', sd, Wdown, eye, precision=hp)
    B_gcn = B_gcn.reshape(C * V, O * V)
    b_gcn = s1 * jnp.sum(bd[:, :, 0], axis=0) + t1 + sd * bdown[:, 0] + td
    b_gcn = jnp.repeat(b_gcn, V).reshape(1, O * V)

    # residual unit_tcn(C, O, kernel_size=1): 1x1 conv + BN -> (C*V, O*V)
    B_res = jnp.einsum('o,oc,uv->cuov', sr, Wr, eye, precision=hp).reshape(C * V, O * V)
    b_res = jnp.repeat(sr * br[:, 0] + tr, V).reshape(1, O * V)

    # tcn1 (K,1) conv + BN: one (O*V, O*V) operator per tap; rows=(p_in, u), cols=(o_out, v)
    # TODO(synk): B_tcn / B_res are Kronecker (W x I_V), i.e. only 1/V dense; fine at these
    #             toy sizes (and halved by bf16), but contract channels only if O/V scale up.
    B_tcn = jnp.einsum('o,kop,uv->kpuov', st, Wt, eye, precision=hp).reshape(K, O * V, O * V)
    b_tcn = jnp.repeat(st * bt[:, 0] + tt, V).reshape(1, O * V)

    to_bf = lambda a: a.astype(jnp.bfloat16)
    # center tap fused with the residual (single MXU call); off-center taps stacked
    B_mid = to_bf(jnp.concatenate([B_res, B_tcn[pad]], axis=0))          # (C*V + O*V, O*V)
    B_tap = to_bf(jnp.stack([B_tcn[k] for k in range(K) if k != pad]))   # (K-1, O*V, O*V)
    b_out = b_res + b_tcn                                                # (1, O*V) f32
    return to_bf(B_gcn), b_gcn, B_mid, B_tap, b_out, (C, O, V, K)


def tcn_gcn_apply(x, params):
    """x: (N, C, T, V) -> lane-dense (N, T, O, V)."""
    B_gcn, b_gcn, B_mid, B_tap, b_out, (C, O, V, K) = params
    N, _, T, _ = x.shape
    R = N * T
    CV, OV = C * V, O * V

    # time-major, lane-dense, samples stacked along rows: (N*T, C*V); bf16 MXU operands
    x_t = jnp.transpose(x, (0, 2, 1, 3)).reshape(R, CV).astype(jnp.bfloat16)

    out = pl.pallas_call(
        _make_kernel(T, K),
        out_shape=jax.ShapeDtypeStruct((R, OV), jnp.float32),
        grid=(1,),
        in_specs=[
            pl.BlockSpec((R, CV), lambda i: (0, 0)),
            pl.BlockSpec((CV, OV), lambda i: (0, 0)),
            pl.BlockSpec((1, OV), lambda i: (0, 0)),
            pl.BlockSpec((CV + OV, OV), lambda i: (0, 0)),
            pl.BlockSpec((K - 1, OV, OV), lambda i: (0, 0, 0)),
            pl.BlockSpec((1, OV), lambda i: (0, 0)),
        ],
        out_specs=pl.BlockSpec((R, OV), lambda i: (0, 0)),
        compiler_params=pltpu.CompilerParams(dimension_semantics=("arbitrary",)),
    )(x_t, B_gcn, b_gcn, B_mid, B_tap, b_out)

    return out.reshape(N, T, O, V)               # keep lane-dense / time-major between units


def tcn_gcn_unit(x, *args):
    params = fold_params(*args)                  # weight-only; cache across forwards at inference
    y = tcn_gcn_apply(x, params)                 # (N, T, O, V)
    return jnp.transpose(y, (0, 2, 1, 3))        # NCHW only at the network boundary


def reference_forward(x, A, Wd, bd, bn1_s, bn1_b, Wdown, bdown, dbn_s, dbn_b,
                      Wt, bt, tbn_s, tbn_b, Wr, br, rbn_s, rbn_b):
    hp = jax.lax.Precision.HIGHEST
    N, C, T, V = x.shape
    S, O, K = A.shape[0], Wdown.shape[0], Wt.shape[0]
    pad = (K - 1) // 2
    ch = lambda v: v.reshape(1, -1, 1, 1)

    An = A / (jnp.sqrt(jnp.sum(A * A, axis=1, keepdims=True)) + 0.0001)
    y = jnp.zeros((N, O, T, V), jnp.float32)
    for i in range(S):
        z = jnp.matmul(x.reshape(N, C * T, V), An[i], precision=hp).reshape(N, C, T, V)
        z = jnp.einsum('oc,nctv->notv', Wd[i], z, precision=hp) + ch(bd[i])
        y = y + z
    y = y * ch(bn1_s) + ch(bn1_b)
    dn = jnp.einsum('oc,nctv->notv', Wdown, x, precision=hp)
    dn = (dn + ch(bdown)) * ch(dbn_s) + ch(dbn_b)
    y = jnp.maximum(y + dn, 0.0)

    yp = jnp.pad(y, ((0, 0), (0, 0), (pad, pad), (0, 0)))
    t = jnp.zeros((N, O, T, V), jnp.float32)
    for k in range(K):
        t = t + jnp.einsum('oc,nctv->notv', Wt[k], yp[:, :, k:k + T, :], precision=hp)
    t = (t + ch(bt)) * ch(tbn_s) + ch(tbn_b)

    r = jnp.einsum('oc,nctv->notv', Wr, x, precision=hp)
    r = (r + ch(br)) * ch(rbn_s) + ch(rbn_b)
    return jnp.maximum(t + r, 0.0)


def bn_affine(gamma, beta, running_mean, running_var, eps=1e-5):
    scale = gamma / jnp.sqrt(running_var + eps)
    shift = beta - running_mean * scale
    return scale.reshape(-1, 1), shift.reshape(-1, 1)


if __name__ == "__main__":
    N, C_in, C_out, T, V, S, K = 2, 4, 8, 16, 16, 3, 5

    key = jax.random.PRNGKey(0)
    keys = jax.random.split(key, 6)

    x = jax.random.normal(keys[0], (N, C_in, T, V), jnp.float32)
    # adjacency-like PA (num_subset, V, V)
    A = jax.random.uniform(keys[1], (S, V, V), dtype=jnp.float32)

    # conv_d[i]: 1x1 conv, conv_branch_init -> N(0, sqrt(2/(out*in*1*branches))), bias 0
    std_d = math.sqrt(2.0 / (C_out * C_in * 1 * S))
    Wd = std_d * jax.random.normal(keys[2], (S, C_out, C_in), jnp.float32)
    bd = jnp.zeros((S, C_out, 1), jnp.float32)

    # down: 1x1 conv (kaiming fan_out = C_out) + BN(1,0)
    Wdown = math.sqrt(2.0 / C_out) * jax.random.normal(keys[3], (C_out, C_in), jnp.float32)
    bdown = jnp.zeros((C_out, 1), jnp.float32)

    # tcn1: Conv2d(C_out, C_out, (5,1)), kaiming fan_out = C_out*5; stored as (K, O, C)
    Wt = math.sqrt(2.0 / (C_out * K)) * jax.random.normal(keys[4], (K, C_out, C_out), jnp.float32)
    bt = jnp.zeros((C_out, 1), jnp.float32)

    # residual: unit_tcn(C_in, C_out, kernel_size=1) -> 1x1 conv + BN(1,0)
    Wr = math.sqrt(2.0 / C_out) * jax.random.normal(keys[5], (C_out, C_in), jnp.float32)
    br = jnp.zeros((C_out, 1), jnp.float32)

    ones = jnp.ones((C_out,), jnp.float32)
    zeros = jnp.zeros((C_out,), jnp.float32)
    bn1_s, bn1_b = bn_affine(jnp.full((C_out,), 1e-6, jnp.float32), zeros, zeros, ones)  # bn_init(bn, 1e-6)
    dbn_s, dbn_b = bn_affine(ones, zeros, zeros, ones)
    tbn_s, tbn_b = bn_affine(ones, zeros, zeros, ones)
    rbn_s, rbn_b = bn_affine(ones, zeros, zeros, ones)

    args = (A, Wd, bd, bn1_s, bn1_b, Wdown, bdown, dbn_s, dbn_b,
            Wt, bt, tbn_s, tbn_b, Wr, br, rbn_s, rbn_b)

    out = jax.block_until_ready(tcn_gcn_unit(x, *args))
    ref = jax.block_until_ready(reference_forward(x, *args))

    # bf16 MXU operands (f32 accumulation) vs f32-HIGHEST reference -> 2e-2 tolerance.
    np.testing.assert_allclose(np.asarray(out), np.asarray(ref), rtol=2e-2, atol=2e-2)

    print("KERNEL_OK")
</pallas_src>

<mosaic_0001>
module attributes {stable_mosaic.version = 11 : i64} {
  func.func @kernel(%arg0: i32, %arg1: memref<32x64xbf16, #tpu.memory_space<vmem>>, %arg2: memref<64x128xbf16, #tpu.memory_space<vmem>>, %arg3: memref<1x128xf32, #tpu.memory_space<vmem>>, %arg4: memref<192x128xbf16, #tpu.memory_space<vmem>>, %arg5: memref<4x128x128xbf16, #tpu.memory_space<vmem>>, %arg6: memref<1x128xf32, #tpu.memory_space<vmem>>, %arg7: memref<32x128xf32, #tpu.memory_space<vmem>>) attributes {dimension_semantics = [#tpu.dimension_semantics<arbitrary>], iteration_bounds = array<i64: 1>, scalar_prefetch = 0 : i64, scratch_operands = 0 : i64, tpu.core_type = #tpu.core_type<tc>, window_params = [{pipeline_mode = #tpu.pipeline_mode<synchronous>, transform_indices = @transform_0, window_bounds = array<i64: 32, 64>}, {pipeline_mode = #tpu.pipeline_mode<synchronous>, transform_indices = @transform_1, window_bounds = array<i64: 64, 128>}, {pipeline_mode = #tpu.pipeline_mode<synchronous>, transform_indices = @transform_2, window_bounds = array<i64: 1, 128>}, {pipeline_mode = #tpu.pipeline_mode<synchronous>, transform_indices = @transform_3, window_bounds = array<i64: 192, 128>}, {pipeline_mode = #tpu.pipeline_mode<synchronous>, transform_indices = @transform_4, window_bounds = array<i64: 4, 128, 128>}, {pipeline_mode = #tpu.pipeline_mode<synchronous>, transform_indices = @transform_5, window_bounds = array<i64: 1, 128>}, {pipeline_mode = #tpu.pipeline_mode<synchronous>, transform_indices = @transform_6, window_bounds = array<i64: 32, 128>}]} {
    %c0 = arith.constant 0 : index
    %c0_0 = arith.constant 0 : index
    %0 = vector.load %arg1[%c0, %c0_0] : memref<32x64xbf16, #tpu.memory_space<vmem>>, vector<32x64xbf16>
    %c0_1 = arith.constant 0 : index
    %c0_2 = arith.constant 0 : index
    %1 = vector.load %arg2[%c0_1, %c0_2] : memref<64x128xbf16, #tpu.memory_space<vmem>>, vector<64x128xbf16>
    %cst = arith.constant dense<0.000000e+00> : vector<32x128xf32>
    %2 = tpu.matmul %0, %1, %cst {dimension_numbers = #tpu.dot_dimension_numbers<[1], [0], [0], [1], [0, 0, 1, 1], [], []>} : vector<32x64xbf16>, vector<64x128xbf16>, vector<32x128xf32> -> vector<32x128xf32>
    %c0_3 = arith.constant 0 : index
    %c0_4 = arith.constant 0 : index
    %3 = vector.load %arg3[%c0_3, %c0_4] : memref<1x128xf32, #tpu.memory_space<vmem>>, vector<1x128xf32>
    %4 = vector.broadcast %3 : vector<1x128xf32> to vector<32x128xf32>
    %5 = arith.addf %2, %4 : vector<32x128xf32>
    %cst_5 = arith.constant 0.000000e+00 : f32
    %6 = vector.broadcast %cst_5 : f32 to vector<32x128xf32>
    %7 = arith.maximumf %5, %6 : vector<32x128xf32>
    %8 = arith.truncf %7 : vector<32x128xf32> to vector<32x128xbf16>
    %9 = tpu.concatenate %0, %8 in 1 : vector<32x64xbf16>, vector<32x128xbf16> -> vector<32x192xbf16>
    %c0_6 = arith.constant 0 : index
    %c0_7 = arith.constant 0 : index
    %10 = vector.load %arg4[%c0_6, %c0_7] : memref<192x128xbf16, #tpu.memory_space<vmem>>, vector<192x128xbf16>
    %cst_8 = arith.constant dense<0.000000e+00> : vector<32x128xf32>
    %11 = tpu.matmul %9, %10, %cst_8 {dimension_numbers = #tpu.dot_dimension_numbers<[1], [0], [0], [1], [0, 0, 1, 1], [], []>} : vector<32x192xbf16>, vector<192x128xbf16>, vector<32x128xf32> -> vector<32x128xf32>
    %12 = tpu.iota {dimensions = array<i32: 0>} : vector<32x1xi32>
    %c16_i32 = arith.constant 16 : i32
    %c0_i32 = arith.constant 0 : i32
    %13 = arith.cmpi eq, %c16_i32, %c0_i32 : i32
    %c1_i32 = arith.constant 1 : i32
    %14 = arith.select %13, %c1_i32, %c16_i32 : i32
    %15 = vector.broadcast %14 : i32 to vector<32x1xi32>
    %16 = arith.remsi %12, %15 : vector<32x1xi32>
    %c0_i32_9 = arith.constant 0 : i32
    %17 = vector.broadcast %c0_i32_9 : i32 to vector<32x1xi32>
    %18 = arith.cmpi ne, %16, %17 : vector<32x1xi32>
    %c0_i32_10 = arith.constant 0 : i32
    %19 = vector.broadcast %c0_i32_10 : i32 to vector<32x1xi32>
    %20 = arith.cmpi slt, %16, %19 : vector<32x1xi32>
    %c0_i32_11 = arith.constant 0 : i32
    %21 = arith.cmpi slt, %14, %c0_i32_11 : i32
    %22 = vector.broadcast %21 : i1 to vector<32x1xi1>
    %23 = vector.broadcast %22 : vector<32x1xi1> to vector<32x1xi1>
    %24 = arith.xori %20, %23 : vector<32x1xi1>
    %25 = arith.andi %24, %18 : vector<32x1xi1>
    %26 = vector.broadcast %14 : i32 to vector<32x1xi32>
    %27 = arith.addi %16, %26 : vector<32x1xi32>
    %28 = arith.select %25, %27, %16 : vector<32x1xi1>, vector<32x1xi32>
    %c2_i32 = arith.constant 2 : i32
    %29 = tpu.dynamic_rotate %7 by %c2_i32 dim 0 : vector<32x128xf32>, i32 -> vector<32x128xf32>
    %c2_i32_12 = arith.constant 2 : i32
    %30 = vector.broadcast %c2_i32_12 : i32 to vector<32x1xi32>
    %31 = arith.cmpi sge, %28, %30 : vector<32x1xi32>
    %cst_13 = arith.constant 0.000000e+00 : f32
    %32 = vector.shape_cast %31 : vector<32x1xi1> to vector<32x1xi1>
    %33 = vector.broadcast %32 : vector<32x1xi1> to vector<32x128xi1>
    %34 = vector.broadcast %cst_13 : f32 to vector<32x128xf32>
    %35 = arith.select %33, %29, %34 : vector<32x128xi1>, vector<32x128xf32>
    %36 = arith.truncf %35 : vector<32x128xf32> to vector<32x128xbf16>
    %c0_14 = arith.constant 0 : index
    %c0_15 = arith.constant 0 : index
    %c0_16 = arith.constant 0 : index
    %37 = vector.load %arg5[%c0_14, %c0_15, %c0_16] : memref<4x128x128xbf16, #tpu.memory_space<vmem>>, vector<1x128x128xbf16>
    %38 = vector.shape_cast %37 : vector<1x128x128xbf16> to vector<128x128xbf16>
    %cst_17 = arith.constant dense<0.000000e+00> : vector<32x128xf32>
    %39 = tpu.matmul %36, %38, %cst_17 {dimension_numbers = #tpu.dot_dimension_numbers<[1], [0], [0], [1], [0, 0, 1, 1], [], []>} : vector<32x128xbf16>, vector<128x128xbf16>, vector<32x128xf32> -> vector<32x128xf32>
    %40 = arith.addf %11, %39 : vector<32x128xf32>
    %c1_i32_18 = arith.constant 1 : i32
    %41 = tpu.dynamic_rotate %7 by %c1_i32_18 dim 0 : vector<32x128xf32>, i32 -> vector<32x128xf32>
    %c1_i32_19 = arith.constant 1 : i32
    %42 = vector.broadcast %c1_i32_19 : i32 to vector<32x1xi32>
    %43 = arith.cmpi sge, %28, %42 : vector<32x1xi32>
    %cst_20 = arith.constant 0.000000e+00 : f32
    %44 = vector.shape_cast %43 : vector<32x1xi1> to vector<32x1xi1>
    %45 = vector.broadcast %44 : vector<32x1xi1> to vector<32x128xi1>
    %46 = vector.broadcast %cst_20 : f32 to vector<32x128xf32>
    %47 = arith.select %45, %41, %46 : vector<32x128xi1>, vector<32x128xf32>
    %48 = arith.truncf %47 : vector<32x128xf32> to vector<32x128xbf16>
    %c1 = arith.constant 1 : index
    %c0_21 = arith.constant 0 : index
    %c0_22 = arith.constant 0 : index
    %49 = vector.load %arg5[%c1, %c0_21, %c0_22] : memref<4x128x128xbf16, #tpu.memory_space<vmem>>, vector<1x128x128xbf16>
    %50 = vector.shape_cast %49 : vector<1x128x128xbf16> to vector<128x128xbf16>
    %cst_23 = arith.constant dense<0.000000e+00> : vector<32x128xf32>
    %51 = tpu.matmul %48, %50, %cst_23 {dimension_numbers = #tpu.dot_dimension_numbers<[1], [0], [0], [1], [0, 0, 1, 1], [], []>} : vector<32x128xbf16>, vector<128x128xbf16>, vector<32x128xf32> -> vector<32x128xf32>
    %52 = arith.addf %40, %51 : vector<32x128xf32>
    %c31_i32 = arith.constant 31 : i32
    %53 = tpu.dynamic_rotate %7 by %c31_i32 dim 0 : vector<32x128xf32>, i32 -> vector<32x128xf32>
    %c15_i32 = arith.constant 15 : i32
    %54 = vector.broadcast %c15_i32 : i32 to vector<32x1xi32>
    %55 = arith.cmpi slt, %28, %54 : vector<32x1xi32>
    %cst_24 = arith.constant 0.000000e+00 : f32
    %56 = vector.shape_cast %55 : vector<32x1xi1> to vector<32x1xi1>
    %57 = vector.broadcast %56 : vector<32x1xi1> to vector<32x128xi1>
    %58 = vector.broadcast %cst_24 : f32 to vector<32x128xf32>
    %59 = arith.select %57, %53, %58 : vector<32x128xi1>, vector<32x128xf32>
    %60 = arith.truncf %59 : vector<32x128xf32> to vector<32x128xbf16>
    %c2 = arith.constant 2 : index
    %c0_25 = arith.constant 0 : index
    %c0_26 = arith.constant 0 : index
    %61 = vector.load %arg5[%c2, %c0_25, %c0_26] : memref<4x128x128xbf16, #tpu.memory_space<vmem>>, vector<1x128x128xbf16>
    %62 = vector.shape_cast %61 : vector<1x128x128xbf16> to vector<128x128xbf16>
    %cst_27 = arith.constant dense<0.000000e+00> : vector<32x128xf32>
    %63 = tpu.matmul %60, %62, %cst_27 {dimension_numbers = #tpu.dot_dimension_numbers<[1], [0], [0], [1], [0, 0, 1, 1], [], []>} : vector<32x128xbf16>, vector<128x128xbf16>, vector<32x128xf32> -> vector<32x128xf32>
    %64 = arith.addf %52, %63 : vector<32x128xf32>
    %c30_i32 = arith.constant 30 : i32
    %65 = tpu.dynamic_rotate %7 by %c30_i32 dim 0 : vector<32x128xf32>, i32 -> vector<32x128xf32>
    %c14_i32 = arith.constant 14 : i32
    %66 = vector.broadcast %c14_i32 : i32 to vector<32x1xi32>
    %67 = arith.cmpi slt, %28, %66 : vector<32x1xi32>
    %cst_28 = arith.constant 0.000000e+00 : f32
    %68 = vector.shape_cast %67 : vector<32x1xi1> to vector<32x1xi1>
    %69 = vector.broadcast %68 : vector<32x1xi1> to vector<32x128xi1>
    %70 = vector.broadcast %cst_28 : f32 to vector<32x128xf32>
    %71 = arith.select %69, %65, %70 : vector<32x128xi1>, vector<32x128xf32>
    %72 = arith.truncf %71 : vector<32x128xf32> to vector<32x128xbf16>
    %c3 = arith.constant 3 : index
    %c0_29 = arith.constant 0 : index
    %c0_30 = arith.constant 0 : index
    %73 = vector.load %arg5[%c3, %c0_29, %c0_30] : memref<4x128x128xbf16, #tpu.memory_space<vmem>>, vector<1x128x128xbf16>
    %74 = vector.shape_cast %73 : vector<1x128x128xbf16> to vector<128x128xbf16>
    %cst_31 = arith.constant dense<0.000000e+00> : vector<32x128xf32>
    %75 = tpu.matmul %72, %74, %cst_31 {dimension_numbers = #tpu.dot_dimension_numbers<[1], [0], [0], [1], [0, 0, 1, 1], [], []>} : vector<32x128xbf16>, vector<128x128xbf16>, vector<32x128xf32> -> vector<32x128xf32>
    %76 = arith.addf %64, %75 : vector<32x128xf32>
    %c0_32 = arith.constant 0 : index
    %c0_33 = arith.constant 0 : index
    %77 = vector.load %arg6[%c0_32, %c0_33] : memref<1x128xf32, #tpu.memory_space<vmem>>, vector<1x128xf32>
    %78 = vector.broadcast %77 : vector<1x128xf32> to vector<32x128xf32>
    %79 = arith.addf %76, %78 : vector<32x128xf32>
    %cst_34 = arith.constant 0.000000e+00 : f32
    %80 = vector.broadcast %cst_34 : f32 to vector<32x128xf32>
    %81 = arith.maximumf %79, %80 : vector<32x128xf32>
    %c0_35 = arith.constant 0 : index
    %c0_36 = arith.constant 0 : index
    %82 = vector.load %arg7[%c0_35, %c0_36] : memref<32x128xf32, #tpu.memory_space<vmem>>, vector<32x128xf32>
    tpu.vector_store %arg7[%c0_35, %c0_36], %81 {strides = array<i32>} : memref<32x128xf32, #tpu.memory_space<vmem>>, vector<32x128xf32>,
    return
  }
  func.func @transform_0(%arg0: i32) -> (i32, i32) {
    %c0_i32 = arith.constant 0 : i32
    %c0_i32_0 = arith.constant 0 : i32
    %c0_i32_1 = arith.constant 0 : i32
    return %c0_i32, %c0_i32_0 : i32, i32
  }
  func.func @transform_1(%arg0: i32) -> (i32, i32) {
    %c0_i32 = arith.constant 0 : i32
    %c0_i32_0 = arith.constant 0 : i32
    %c0_i32_1 = arith.constant 0 : i32
    return %c0_i32, %c0_i32_0 : i32, i32
  }
  func.func @transform_2(%arg0: i32) -> (i32, i32) {
    %c0_i32 = arith.constant 0 : i32
    %c0_i32_0 = arith.constant 0 : i32
    %c0_i32_1 = arith.constant 0 : i32
    return %c0_i32, %c0_i32_0 : i32, i32
  }
  func.func @transform_3(%arg0: i32) -> (i32, i32) {
    %c0_i32 = arith.constant 0 : i32
    %c0_i32_0 = arith.constant 0 : i32
    %c0_i32_1 = arith.constant 0 : i32
    return %c0_i32, %c0_i32_0 : i32, i32
  }
  func.func @transform_4(%arg0: i32) -> (i32, i32, i32) {
    %c0_i32 = arith.constant 0 : i32
    %c0_i32_0 = arith.constant 0 : i32
    %c0_i32_1 = arith.constant 0 : i32
    %c0_i32_2 = arith.constant 0 : i32
    return %c0_i32, %c0_i32_0, %c0_i32_1 : i32, i32, i32
  }
  func.func @transform_5(%arg0: i32) -> (i32, i32) {
    %c0_i32 = arith.constant 0 : i32
    %c0_i32_0 = arith.constant 0 : i32
    %c0_i32_1 = arith.constant 0 : i32
    return %c0_i32, %c0_i32_0 : i32, i32
  }
  func.func @transform_6(%arg0: i32) -> (i32, i32) {
    %c0_i32 = arith.constant 0 : i32
    %c0_i32_0 = arith.constant 0 : i32
    %c0_i32_1 = arith.constant 0 : i32
    return %c0_i32, %c0_i32_0 : i32, i32
  }
}

</mosaic_0001>

<bundles_post_ra>
// kernel: tpu_custom_call.1
= control target key start
LH: loop header
LB: loop body
LE: loop exit
PB: predicated region body
PF: predicated region fallthrough
CT: control target
= control target key end

     0   :  { %11 = vsyncpa [#allocation3], 0  ;;  %s1644_s0 = inlined_call_operand.hbm [shape: bf16[32,64], index: 0, kind: input, shape index: {}]   ;;  %s1645_s1 = inlined_call_operand.hbm [shape: bf16[64,128], index: 1, kind: input, shape index: {}]   ;;  %s1646_s2 = inlined_call_operand.vmem [shape: f32[1,128], index: 2, kind: input, shape index: {}]   ;;  %s1647_s3 = inlined_call_operand.hbm [shape: bf16[192,128], index: 3, kind: input, shape index: {}]   ;;  %s1648_s4 = inlined_call_operand.hbm [shape: bf16[4,128,128], index: 4, kind: input, shape index: {}]   ;;  %s1649_s5 = inlined_call_operand.vmem [shape: f32[1,128], index: 5, kind: input, shape index: {}]   ;;  %s1650_s6 = inlined_call_operand.hbm [shape: f32[32,128], index: 6, kind: output, shape index: {}]  }
   0x1   :  { %12 = vsyncpa [#allocation6], 0 }
   0x2   :  { %13 = vsyncpa [#allocation9], 0 }
   0x3   :  { %14 = vsyncpa [#allocation4], 0  ;;  %s1409_s21 = smov [#allocation5]   ;;  %s1410_s23 = smov [#allocation2]  }
   0x4   :  { %s32_s22 = sshll.u32 %s1409_s21, 4  ;;  %s20_s24 = sshll.u32 %s1410_s23, 4  ;;  %s33_s22 = int_to_ptr.vmem [resolvable:$true] %s32_s22  ;;  %s21_s24 = int_to_ptr.vmem [resolvable:$true] %s20_s24 }
   0x5   :  { %s1309_s25 = scalar_lea.vmem %s33_s22, 512  ;;  %p1314_p1 = scmp.lt.s32.totalorder %s33_s22, %s33_s22 }
   0x6   :  { %p1310_p0 = scmp.ne.s32.totalorder %s33_s22, %s1309_s25  ;;  %p1315_p2 = scmp.lt.s32.totalorder %s1309_s25, %s1309_s25 }
   0x8   :  { %p1316_p3 = por %p1315_p2, %p1314_p1 }
   0xa   :  { %p1317_p4 = pnand %p1316_p3, %p1310_p0 }
   0xc   :  { %1320 = shalt.err (!%p1317_p4)
}
   0xd   :  { %s1411_s26 = smov 64   ;;  %s1412_s27 = smov 4  }
   0xe   :  { %38 = dma.hbm_to_vmem [thread:$0]  %s1645_s1, 512, %s33_s22, [#allocation6], %s1411_s26, %s1411_s26, %s1412_s27  }
   0xf   :  { %s1329_s30 = scalar_lea.vmem %s21_s24, 256  ;;  %p1334_p6 = scmp.lt.s32.totalorder %s21_s24, %s21_s24 }
  0x10   :  { %p1330_p5 = scmp.ne.s32.totalorder %s21_s24, %s1329_s30  ;;  %p1335_p7 = scmp.lt.s32.totalorder %s1329_s30, %s1329_s30 }
  0x12   :  { %p1336_p8 = por %p1335_p7, %p1334_p6 }
  0x14   :  { %p1337_p9 = pnand %p1336_p8, %p1330_p5 }
  0x16   :  { %1340 = shalt.err (!%p1337_p9)
}
  0x17   :  { %26 = dma.hbm_to_vmem [thread:$0]  %s1644_s0, 256, %s21_s24, [#allocation3], %s1411_s26, %s1411_s26, %s1412_s27  }
  0x18   :  { %s1413_s9 = smov [#allocation7]   ;;  %s1414_s11 = smov [#allocation8]  }
  0x19   :  { %s46_s10 = sshll.u32 %s1413_s9, 4  ;;  %s58_s12 = sshll.u32 %s1414_s11, 4  ;;  %s47_s10 = int_to_ptr.vmem [resolvable:$true] %s46_s10  ;;  %s59_s12 = int_to_ptr.vmem [resolvable:$true] %s58_s12 }
  0x1a   :  { %s1349_s1 = scalar_lea.vmem %s47_s10, 1536  ;;  %p1354_p11 = scmp.lt.s32.totalorder %s47_s10, %s47_s10 }
  0x1b   :  { %p1350_p10 = scmp.ne.s32.totalorder %s47_s10, %s1349_s1  ;;  %p1355_p12 = scmp.lt.s32.totalorder %s1349_s1, %s1349_s1 }
  0x1d   :  { %p1356_p13 = por %p1355_p12, %p1354_p11 }
  0x1f   :  { %p1357_p0 = pnand %p1356_p13, %p1350_p10 }
  0x21   :  { %1360 = shalt.err (!%p1357_p0)
}
  0x22   :  { %52 = dma.hbm_to_vmem [thread:$0]  %s1647_s3, 1536, %s47_s10, [#allocation6], %s1411_s26, %s1411_s26, %s1412_s27  }
  0x23   :  { %s1369_s0 = scalar_lea.vmem %s59_s12, 4096  ;;  %p1374_p2 = scmp.lt.s32.totalorder %s59_s12, %s59_s12 }
  0x24   :  { %p1370_p1 = scmp.ne.s32.totalorder %s59_s12, %s1369_s0  ;;  %p1375_p3 = scmp.lt.s32.totalorder %s1369_s0, %s1369_s0 }
  0x26   :  { %p1376_p4 = por %p1375_p3, %p1374_p2 }
  0x28   :  { %p1377_p5 = pnand %p1376_p4, %p1370_p1 }
  0x2a   :  { %1380 = shalt.err (!%p1377_p5)
}
  0x2b   :  { %64 = dma.hbm_to_vmem [thread:$0]  %s1648_s4, 4096, %s59_s12, [#allocation9], %s1411_s26, %s1411_s26, %s1412_s27  }
  0x2c   :  { %1401 = dma.done.wait [#allocation3], 256  }
  0x2d   :  { %1402 = vsyncadd [#allocation3], 4294967040 }
  0x2e   :  { %1403 = dma.done.wait [#allocation6], 2048  }
  0x2f   :  { %1404 = vsyncadd [#allocation6], 4294965248 }
  0x30   :  { %1405 = dma.done.wait [#allocation9], 4096  }
  0x31   :  { %1406 = vsyncadd [#allocation9], 4294963200  ;;  %v1251_v0 = vld [vmem:[#allocation5 + $0x18] sm:$0xff]   ;;  %v1252_v1 = vld [vmem:[#allocation5 + $0x10] sm:$0xff]   ;;  %vm133_vm0 = vcmask 523264   ;;  %v1415_v15 = vmov 0   ;;  %v231_v27 = vlaneseq }
  0x32   :  { %1148 = vmatprep.subr.bf16.mxu0 %v1251_v0  ;;  %v1253_v2 = vld [vmem:[#allocation5 + $0x8] sm:$0xff]   ;;  %v1479_v3 = vld [vmem:[#allocation2] sm:$0xff]   ;;  %v1257_v4 = vld [vmem:[#allocation8 + $0x38] sm:$0xff]   ;;  %vm1416_vm7 = vmmov 1  }
  0x33   :  { %1149 = vmatpush3.bf16.msra.mxu0 %v1251_v0  ;;  %1156 = vmatprep.mubr.msk.bf16.mxu0 %vm133_vm0, %v1479_v3  ;;  %v1258_v5 = vld [vmem:[#allocation8 + $0x30] sm:$0xff]   ;;  %v1254_v6 = vld [vmem:[#allocation5] sm:$0xff]   ;;  %v1259_v7 = vld [vmem:[#allocation8 + $0x28] sm:$0xff]   ;;  %v1490_v29 = vshrl.u32 %v231_v27, 7 }
  0x34   :  { %1150 = vmatprep.subr.bf16.mxu0 %v1252_v1  ;;  %1160 = vmatprep.subr.bf16.mxu1 %v1257_v4  ;;  %v1483_v8 = vld [vmem:[#allocation2 + $0x8] sm:$0xff]   ;;  %v1260_v9 = vld [vmem:[#allocation8 + $0x20] sm:$0xff]   ;;  %v1262_v11 = vld [vmem:[#allocation8 + $0x10] sm:$0xff]  }
  0x35   :  { %1161 = vmatpush3.bf16.msra.mxu1 %v1257_v4  ;;  %v1261_v10 = vld [vmem:[#allocation8 + $0x18] sm:$0xff]   ;;  %v1263_v12 = vld [vmem:[#allocation8 + $0x8] sm:$0xff]   ;;  %v1264_v13 = vld [vmem:[#allocation8] sm:$0xff]   ;;  %v1498_v35 = vadd.s32 16, %v1490_v29  ;;  %v240_v41 = vand.u32 15, %v1490_v29  ;;  %vm288_vm1 = vcmp.lt.s32.totalorder %v1490_v29, 2 }
  0x36   :  { %1162 = vmatprep.subr.bf16.mxu1 %v1258_v5  ;;  %v1487_v14 = vld [vmem:[#allocation8 + $0x78] sm:$0xff]   ;;  %v1282_v17 = vld [vmem:[#allocation7 + $0x30] sm:$0xff]   ;;  %v1283_v18 = vld [vmem:[#allocation7 + $0x28] sm:$0xff]   ;;  %vm553_vm2 = vcmp.lt.s32.totalorder %v1490_v29, 1  ;;  %vm698_vm5 = vcmp.lt.s32.totalorder %v1490_v29, 7  ;;  %vm843_vm12 = vcmp.lt.s32.totalorder %v1490_v29, 6 }
  0x37   :  { %1151 = vmatpush3.bf16.msra.mxu0 %v1252_v1  ;;  %v1281_v16 = vld [vmem:[#allocation7 + $0x38] sm:$0xff]   ;;  %v1284_v19 = vld [vmem:[#allocation7 + $0x20] sm:$0xff]   ;;  %v1286_v21 = vld [vmem:[#allocation7 + $0x10] sm:$0xff]   ;;  %v254_v42 = vand.u32 15, %v1498_v35  ;;  %vm1514_vm3 = vcmp.ge.s32.totalorder %v240_v41, 2  ;;  %vm1534_vm6 = vcmp.ge.s32.totalorder %v240_v41, 1 }
  0x38   :  { %1152 = vmatprep.subr.bf16.mxu0 %v1253_v2  ;;  %v1285_v20 = vld [vmem:[#allocation7 + $0x18] sm:$0xff]   ;;  %v1287_v22 = vld [vmem:[#allocation7 + $0x8] sm:$0xff]   ;;  %v1288_v23 = vld [vmem:[#allocation7] sm:$0xff]  }
  0x39   :  { %1163 = vmatpush3.bf16.msra.mxu1 %v1258_v5  ;;  %v1289_v24 = vld [vmem:[#allocation7 + $0x58] sm:$0xff]   ;;  %v1290_v25 = vld [vmem:[#allocation7 + $0x50] sm:$0xff]   ;;  %v1291_v26 = vld [vmem:[#allocation7 + $0x48] sm:$0xff]   ;;  %vm1521_vm4 = vcmp.ge.s32.totalorder %v254_v42, 2  ;;  %vm560_vm11 = vcmp.ge.s32.totalorder %v254_v42, 1 }
  0x3a   :  { %1164 = vmatprep.subr.bf16.mxu1 %v1259_v7  ;;  %v1292_v28 = vld [vmem:[#allocation7 + $0x40] sm:$0xff]   ;;  %v1022_v30 = vld [vmem:[%s1646_s2] ss:$0 sm:$0xff]  ;;  %v1495_v32 = vld [vmem:[#allocation8 + $0xb8] sm:$0xff]  }
  0x3b   :  { %1153 = vmatpush3.bf16.msra.mxu0 %v1253_v2  ;;  %vm1039_vm8 = vmpackc.low %vm1416_vm7, %vm1514_vm3  ;;  %v1273_v27 = vld [vmem:[#allocation8 + $0xf8] sm:$0xff]   ;;  %v1278_v42 = vld [vmem:[#allocation8 + $0xd0] sm:$0xff]  }
  0x3c   :  { %1154 = vmatprep.subr.bf16.mxu0 %v1254_v6  ;;  %vm1042_vm9 = vmpackc.low %vm1416_vm7, %vm1521_vm4  ;;  %v1277_v41 = vld [vmem:[#allocation8 + $0xd8] sm:$0xff]   ;;  %v1300_v58 = vld [vmem:[#allocation8 + $0x80] sm:$0xff]  }
  0x3d   :  { %1165 = vmatpush3.bf16.msra.mxu1 %v1259_v7  ;;  %vm1067_vm10 = vmpackc.low %vm1416_vm7, %vm1534_vm6 }
  0x3e   :  { %1166 = vmatprep.subr.bf16.mxu1 %v1260_v9  ;;  %vm1070_vm14 = vmpackc.low %vm1416_vm7, %vm560_vm11 }
  0x3f   :  { %1155 = vmatpush3.bf16.msra.mxu0 %v1254_v6  ;;  %v1266_v6 = vld [vmem:[#allocation8 + $0x70] sm:$0xff]  }
  0x40   :  { %500 = vmatprep.subr.bf16.mxu0 %v1415_v15 }
  0x41   :  { %1167 = vmatpush3.bf16.msra.mxu1 %v1260_v9 }
  0x42   :  { %1157 = vmatmul.mubr.msk.bf16.vlgmr.msra.gmra.mxu0 %vm133_vm0, %v1483_v8  ;;  %1168 = vmatprep.subr.bf16.mxu1 %v1261_v10 }
  0x43   :  { %501 = vmatpush1.bf16.msra.mxu0 %v1281_v16 }
  0x44   :  { %502 = vmatprep.subr.bf16.mxu0 %v1415_v15 }
  0x45   :  { %1169 = vmatpush3.bf16.msra.mxu1 %v1261_v10 }
  0x46   :  { %1170 = vmatprep.subr.bf16.mxu1 %v1262_v11 }
  0x47   :  { %503 = vmatpush1.bf16.msra.mxu0 %v1282_v17  ;;  %v1267_v17 = vld [vmem:[#allocation8 + $0x68] sm:$0xff]  }
  0x48   :  { %504 = vmatprep.subr.bf16.mxu0 %v1415_v15 }
  0x49   :  { %1171 = vmatpush3.bf16.msra.mxu1 %v1262_v11 }
  0x4a   :  { %1172 = vmatprep.subr.bf16.mxu1 %v1263_v12 }
  0x4b   :  { %505 = vmatpush1.bf16.msra.mxu0 %v1283_v18 }
  0x4c   :  { %506 = vmatprep.subr.bf16.mxu0 %v1415_v15 }
  0x4d   :  { %1173 = vmatpush3.bf16.msra.mxu1 %v1263_v12 }
  0x4e   :  { %1174 = vmatprep.subr.bf16.mxu1 %v1264_v13 }
  0x4f   :  { %507 = vmatpush1.bf16.msra.mxu0 %v1284_v19  ;;  %v1269_v19 = vld [vmem:[#allocation8 + $0x58] sm:$0xff]  }
  0x50   :  { %508 = vmatprep.subr.bf16.mxu0 %v1415_v15 }
  0x51   :  { %1175 = vmatpush3.bf16.msra.mxu1 %v1264_v13 }
  0x52   :  { %1180 = vmatprep.subr.bf16.mxu1 %v1487_v14 }
  0x53   :  { %509 = vmatpush1.bf16.msra.mxu0 %v1285_v20  ;;  %v1270_v20 = vld [vmem:[#allocation8 + $0x50] sm:$0xff]  }
  0x54   :  { %510 = vmatprep.subr.bf16.mxu0 %v1415_v15 }
  0x57   :  { %511 = vmatpush1.bf16.msra.mxu0 %v1286_v21  ;;  %v1271_v21 = vld [vmem:[#allocation8 + $0x48] sm:$0xff]  }
  0x58   :  { %512 = vmatprep.subr.bf16.mxu0 %v1415_v15 }
  0x5b   :  { %513 = vmatpush1.bf16.msra.mxu0 %v1287_v22  ;;  %v1590_v22 = vadd.s32 8, %v1490_v29 }
  0x5c   :  { %514 = vmatprep.subr.bf16.mxu0 %v1415_v15 }
  0x5f   :  { %515 = vmatpush1.bf16.msra.mxu0 %v1288_v23  ;;  %v1272_v23 = vld [vmem:[#allocation8 + $0x40] sm:$0xff]  }
  0x60   :  { %524 = vmatprep.subr.bf16.mxu0 %v1415_v15 }
  0x63   :  { %525 = vmatpush2.bf16.msra.mxu0 %v1289_v24  ;;  %v247_v24 = vand.u32 15, %v1590_v22  ;;  %v1101_v22 = vld [vmem:[%s1649_s5] ss:$0 sm:$0xff]  ;;  %s1417_s5 = smov [#allocation10]  }
  0x64   :  { %526 = vmatprep.subr.bf16.mxu0 %v1415_v15  ;;  %s1008_s18 = sshll.u32 %s1417_s5, 4  ;;  %s1009_s18 = int_to_ptr.vmem [resolvable:$true] %s1008_s18 }
  0x65   :  { %vm849_vm13 = vcmp.lt.s32.totalorder %v247_v24, 14  ;;  %vm704_vm3 = vcmp.lt.s32.totalorder %v247_v24, 15  ;;  %s1381_s19 = scalar_lea.vmem %s1009_s18, 512  ;;  %p1386_p7 = scmp.lt.s32.totalorder %s1009_s18, %s1009_s18 }
  0x66   :  { %vm1095_vm15 = vmpackc.low %vm849_vm13, %vm1416_vm7  ;;  %p1382_p6 = scmp.ne.s32.totalorder %s1009_s18, %s1381_s19  ;;  %p1387_p8 = scmp.lt.s32.totalorder %s1381_s19, %s1381_s19 }
  0x67   :  { %527 = vmatpush2.bf16.msra.mxu0 %v1290_v25  ;;  %vm1081_vm4 = vmpackc.low %vm704_vm3, %vm1416_vm7 }
  0x68   :  { %528 = vmatprep.subr.bf16.mxu0 %v1415_v15  ;;  %p1388_p9 = por %p1387_p8, %p1386_p7 }
  0x6a   :  { %p1389_p10 = pnand %p1388_p9, %p1382_p6 }
  0x6b   :  { %529 = vmatpush2.bf16.msra.mxu0 %v1291_v26 }
  0x6c   :  { %530 = vmatprep.subr.bf16.mxu0 %v1415_v15 }
  0x6f   :  { %531 = vmatpush2.bf16.msra.mxu0 %v1292_v28 }
  0x70   :  { %1200 = vmatprep.subr.bf16.mxu0 %v1495_v32 }
 0x102   :  { %v1158_v31 = vpop.f32.mrf.mxu0 }
 0x103   :  { %v183_v33 = vadd.f32 %v1158_v31, %v1022_v30 }
 0x104   :  { %v174_v34 = vpop.f32.mrf.mxu0 }
 0x105   :  { %v175_v36 = vadd.f32 %v1022_v30, %v174_v34  ;;  %v1501_v39 = vmax.f32 %v183_v33, 0.0 }
 0x106   :  { %v1159_v37 = vpop.f32.mrf.mxu0 }
 0x107   :  { %v186_v38 = vadd.f32 %v1159_v37, %v1022_v30  ;;  %v1505_v43 = vmax.f32 %v175_v36, 0.0  ;;  %v286_v49 = vrot.slane %v1501_v39, 6  ;;  %v696_v2 = vrot.slane %v1501_v39, 1  ;;  %v1274_v37 = vld [vmem:[#allocation8 + $0xf0] sm:$0xff]  }
 0x108   :  { %v177_v40 = vpop.f32.mrf.mxu0  ;;  %v551_v26 = vrot.slane %v1501_v39, 7 }
 0x109   :  { %v1507_v44 = vmax.f32 %v186_v38, 0.0  ;;  %v178_v45 = vadd.f32 %v1022_v30, %v177_v40  ;;  %v284_v52 = vrot.slane %v1505_v43, 6  ;;  %v549_v56 = vrot.slane %v1505_v43, 7  ;;  %v1276_v40 = vld [vmem:[#allocation8 + $0xe0] sm:$0xff]  }
 0x10a   :  { %v694_v7 = vrot.slane %v1505_v43, 1  ;;  %v839_v28 = vrot.slane %v1505_v43, 2  ;;  %v841_v30 = vrot.slane %v1501_v39, 2 }
 0x10b   :  { %v1510_v46 = vmax.f32 %v178_v45, 0.0  ;;  %v287_v47 = vrot.slane %v1507_v44, 6  ;;  %v552_v54 = vrot.slane %v1507_v44, 7  ;;  %v697_v55 = vrot.slane %v1507_v44, 1 }
 0x10c   :  { %v194_v4 = vpack.c.bf16 %v1507_v44, %v1501_v39  ;;  %v1275_v39 = vld [vmem:[#allocation8 + $0xe8] sm:$0xff]   ;;  %v235_v45 = vadd.s32 24, %v1490_v29  ;;  %v842_v48 = vrot.slane %v1507_v44, 2  ;;  %v1296_v29 = vld [vmem:[#allocation8 + $0xa0] sm:$0xff]  }
 0x10d   :  { %v193_v51 = vpack.c.bf16 %v1510_v46, %v1505_v43  ;;  %v285_v53 = vrot.slane %v1510_v46, 6  ;;  %v550_v57 = vrot.slane %v1510_v46, 7  ;;  %v292_v60 = vsel %vm288_vm1, %v287_v47, %v284_v52  ;;  %v1279_v43 = vld [vmem:[#allocation8 + $0xc8] sm:$0xff]  }
 0x10e   :  { %v289_v61 = vsel %vm288_vm1, %v286_v49, %v287_v47  ;;  %v557_v5 = vsel %vm553_vm2, %v552_v54, %v549_v56  ;;  %v695_v10 = vrot.slane %v1510_v46, 1  ;;  %v1569_v11 = vsel %vm698_vm5, %v696_v2, %v697_v55 }
 0x10f   :  { %197 = vrot.lane.b32.xlu0 %v193_v51, %s1411_s26  ;;  %v291_v59 = vsel %vm288_vm1, %v284_v52, %v285_v53  ;;  %v290_v62 = vsel %vm288_vm1, %v285_v53, %v286_v49  ;;  %v556_v1 = vsel %vm553_vm2, %v549_v56, %v550_v57  ;;  %v1574_v12 = vsel %vm698_vm5, %v697_v55, %v694_v7  ;;  %v1294_v53 = vld [vmem:[#allocation8 + $0xb0] sm:$0xff]   ;;  %v1295_v55 = vld [vmem:[#allocation8 + $0xa8] sm:$0xff]  }
 0x110   :  { %v1040_v63 = vpack.c.bf16 %v291_v59, %v292_v60  ;;  %v1043_v0 = vpack.c.bf16 %v289_v61, %v290_v62  ;;  %v1068_v9 = vpack.c.bf16 %v556_v1, %v557_v5  ;;  %v1579_v13 = vsel %vm698_vm5, %v695_v10, %v696_v2  ;;  %v1298_v56 = vld [vmem:[#allocation8 + $0x90] sm:$0xff]  }
 0x111   :  { %v1583_v15 = vsel %vm698_vm5, %v694_v7, %v695_v10  ;;  %v1085_v16 = vpack.c.bf16 %v1574_v12, %v1569_v11  ;;  %v840_v25 = vrot.slane %v1510_v46, 2  ;;  %v555_v31 = vsel %vm553_vm2, %v550_v57, %v551_v26  ;;  %v1280_v46 = vld [vmem:[#allocation8 + $0xc0] sm:$0xff]   ;;  %v1299_v57 = vld [vmem:[#allocation8 + $0x88] sm:$0xff]  }
 0x112   :  { %1176 = vmatprep.mubr.msk.bf16.mxu1 %vm1039_vm8, %v1040_v63  ;;  %v1082_v18 = vpack.c.bf16 %v1579_v13, %v1583_v15  ;;  %v554_v35 = vsel %vm553_vm2, %v551_v26, %v552_v54  ;;  %v261_v47 = vand.u32 15, %v235_v45  ;;  %v844_v49 = vsel %vm843_vm12, %v841_v30, %v842_v48 }
 0x113   :  { %1177 = vmatmul.mubr.msk.bf16.vlgmr.msra.gmra.mxu1 %vm1042_vm9, %v1043_v0  ;;  %199 = vrot.lane.b32.xlu0 %v194_v4, %s1411_s26  ;;  %v845_v33 = vsel %vm843_vm12, %v840_v25, %v841_v30  ;;  %v846_v34 = vsel %vm843_vm12, %v839_v28, %v840_v25  ;;  %v1071_v36 = vpack.c.bf16 %v554_v35, %v555_v31 }
 0x114   :  { %1181 = vmatpush3.bf16.msra.mxu1 %v1487_v14  ;;  %1196 = vmatprep.mubr.msk.bf16.mxu1 %vm1067_vm10, %v1068_v9  ;;  %v1268_v14 = vld [vmem:[#allocation8 + $0x60] sm:$0xff]   ;;  %v1096_v38 = vpack.c.bf16 %v845_v33, %v846_v34  ;;  %vm851_vm1 = vcmp.lt.s32.totalorder %v261_v47, 14  ;;  %v847_v50 = vsel %vm843_vm12, %v842_v48, %v839_v28 }
 0x115   :  { %1182 = vmatprep.subr.bf16.mxu1 %v1266_v6  ;;  %vm1098_vm2 = vmpackc.low %vm851_vm1, %vm1416_vm7  ;;  %v1099_v51 = vpack.c.bf16 %v847_v50, %v844_v49 }
 0x118   :  { %1183 = vmatpush3.bf16.msra.mxu1 %v1266_v6 }
 0x119   :  { %1184 = vmatprep.subr.bf16.mxu1 %v1267_v17 }
 0x11c   :  { %1185 = vmatpush3.bf16.msra.mxu1 %v1267_v17 }
 0x11d   :  { %1186 = vmatprep.subr.bf16.mxu1 %v1268_v14 }
 0x120   :  { %1187 = vmatpush3.bf16.msra.mxu1 %v1268_v14 }
 0x121   :  { %1188 = vmatprep.subr.bf16.mxu1 %v1269_v19 }
 0x124   :  { %1189 = vmatpush3.bf16.msra.mxu1 %v1269_v19 }
 0x125   :  { %1190 = vmatprep.subr.bf16.mxu1 %v1270_v20 }
 0x128   :  { %1191 = vmatpush3.bf16.msra.mxu1 %v1270_v20 }
 0x129   :  { %1192 = vmatprep.subr.bf16.mxu1 %v1271_v21 }
 0x12c   :  { %1193 = vmatpush3.bf16.msra.mxu1 %v1271_v21 }
 0x12d   :  { %1194 = vmatprep.subr.bf16.mxu1 %v1272_v23 }
 0x130   :  { %1195 = vmatpush3.bf16.msra.mxu1 %v1272_v23 }
 0x131   :  { %1220 = vmatprep.subr.bf16.mxu1 %v1273_v27 }
 0x133   :  { %1197 = vmatmul.mubr.msk.bf16.vlgmr.msra.gmra.mxu1 %vm1070_vm14, %v1071_v36 }
 0x134   :  { %1221 = vmatpush3.bf16.msra.mxu1 %v1273_v27  ;;  %1236 = vmatprep.mubr.msk.bf16.mxu1 %vm1095_vm15, %v1096_v38 }
 0x135   :  { %1222 = vmatprep.subr.bf16.mxu1 %v1274_v37 }
 0x138   :  { %1223 = vmatpush3.bf16.msra.mxu1 %v1274_v37 }
 0x139   :  { %1224 = vmatprep.subr.bf16.mxu1 %v1275_v39 }
 0x13c   :  { %1225 = vmatpush3.bf16.msra.mxu1 %v1275_v39 }
 0x13d   :  { %1226 = vmatprep.subr.bf16.mxu1 %v1276_v40 }
 0x140   :  { %1227 = vmatpush3.bf16.msra.mxu1 %v1276_v40 }
 0x141   :  { %1228 = vmatprep.subr.bf16.mxu1 %v1277_v41 }
 0x144   :  { %1229 = vmatpush3.bf16.msra.mxu1 %v1277_v41 }
 0x145   :  { %1230 = vmatprep.subr.bf16.mxu1 %v1278_v42 }
 0x148   :  { %1231 = vmatpush3.bf16.msra.mxu1 %v1278_v42 }
 0x149   :  { %1232 = vmatprep.subr.bf16.mxu1 %v1279_v43 }
 0x14c   :  { %1233 = vmatpush3.bf16.msra.mxu1 %v1279_v43 }
 0x14d   :  { %1234 = vmatprep.subr.bf16.mxu1 %v1280_v46 }
 0x150   :  { %1235 = vmatpush3.bf16.msra.mxu1 %v1280_v46 }
 0x153   :  { %1237 = vmatmul.mubr.msk.bf16.vlgmr.msra.gmra.mxu1 %vm1098_vm2, %v1099_v51 }
 0x181   :  { %v198_v52 = vpop.permute.xlu0 %197 }
 0x182   :  { %v202_v54 = vsel %vm133_vm0, %v1479_v3, %v198_v52  ;;  %1057 = vmatprep.mubr.msk.bf16.mxu0 %vm133_vm0, %v198_v52 }
 0x183   :  { %533 = vmatmul.mubr.bf16.vlgmr.msra.gmra.mxu0 %v202_v54 }
 0x184   :  { %1201 = vmatpush3.bf16.msra.mxu0 %v1495_v32  ;;  %v1297_v32 = vld [vmem:[#allocation8 + $0x98] sm:$0xff]  }
 0x185   :  { %v200_v44 = vpop.permute.xlu0 %199  ;;  %1202 = vmatprep.subr.bf16.mxu0 %v1294_v53 }
 0x186   :  { %1058 = vmatprep.mubr.msk.bf16.mxu0 %vm133_vm0, %v200_v44  ;;  %v205_v3 = vsel %vm133_vm0, %v1483_v8, %v200_v44  ;;  %vm706_vm0 = vcmp.lt.s32.totalorder %v261_v47, 15 }
 0x187   :  { %vm1084_vm5 = vmpackc.low %vm706_vm0, %vm1416_vm7 }
 0x188   :  { %1203 = vmatpush3.bf16.msra.mxu0 %v1294_v53 }
 0x189   :  { %1204 = vmatprep.subr.bf16.mxu0 %v1295_v55 }
 0x18b   :  { %541 = vmatmul.mubr.bf16.gmra.mxu0 %v205_v3 }
 0x18c   :  { %1205 = vmatpush3.bf16.msra.mxu0 %v1295_v55  ;;  %1216 = vmatprep.mubr.msk.bf16.mxu0 %vm1081_vm4, %v1082_v18 }
 0x18d   :  { %1206 = vmatprep.subr.bf16.mxu0 %v1296_v29 }
 0x190   :  { %1207 = vmatpush3.bf16.msra.mxu0 %v1296_v29 }
 0x191   :  { %1208 = vmatprep.subr.bf16.mxu0 %v1297_v32 }
 0x194   :  { %1209 = vmatpush3.bf16.msra.mxu0 %v1297_v32 }
 0x195   :  { %1210 = vmatprep.subr.bf16.mxu0 %v1298_v56 }
 0x198   :  { %1211 = vmatpush3.bf16.msra.mxu0 %v1298_v56 }
 0x199   :  { %1212 = vmatprep.subr.bf16.mxu0 %v1299_v57 }
 0x19c   :  { %1213 = vmatpush3.bf16.msra.mxu0 %v1299_v57 }
 0x19d   :  { %1214 = vmatprep.subr.bf16.mxu0 %v1300_v58 }
 0x1a0   :  { %1215 = vmatpush3.bf16.msra.mxu0 %v1300_v58 }
 0x1a3   :  { %1217 = vmatmul.mubr.msk.bf16.vlgmr.msra.gmra.mxu0 %vm1084_vm5, %v1085_v16 }
 0x1d3   :  { %v1178_v8 = vpop.f32.mrf.mxu1 }
 0x1d5   :  { %v409_v61 = vpop.f32.mrf.mxu1 }
 0x1d7   :  { %v1179_v0 = vpop.f32.mrf.mxu1 }
 0x1d9   :  { %v412_v4 = vpop.f32.mrf.mxu1 }
 0x1f3   :  { %v1198_v6 = vpop.f32.mrf.mxu1 }
 0x1f5   :  { %v675_v9 = vpop.f32.mrf.mxu1 }
 0x1f7   :  { %v1199_v10 = vpop.f32.mrf.mxu1 }
 0x1f9   :  { %v678_v13 = vpop.f32.mrf.mxu1 }
 0x213   :  { %v1238_v17 = vpop.f32.mrf.mxu1 }
 0x215   :  { %v965_v18 = vpop.f32.mrf.mxu1 }
 0x217   :  { %v1239_v27 = vpop.f32.mrf.mxu1 }
 0x219   :  { %v968_v40 = vpop.f32.mrf.mxu1 }
 0x243   :  { %v534_v59 = vpop.f32.mrf.mxu0 }
 0x244   :  { %v535_v11 = vadd.f32 %v534_v59, %v409_v61 }
 0x245   :  { %v536_v60 = vpop.f32.mrf.mxu0 }
 0x246   :  { %v690_v21 = vadd.f32 %v675_v9, %v535_v11 }
 0x247   :  { %v537_v62 = vpop.f32.mrf.mxu0 }
 0x248   :  { %v538_v19 = vadd.f32 %v537_v62, %v412_v4 }
 0x249   :  { %v539_v63 = vpop.f32.mrf.mxu0 }
 0x24a   :  { %v691_v34 = vadd.f32 %v678_v13, %v538_v19 }
 0x24b   :  { %v542_v1 = vpop.f32.mrf.mxu0 }
 0x24c   :  { %v543_v15 = vadd.f32 %v1178_v8, %v542_v1 }
 0x24d   :  { %v544_v2 = vpop.f32.mrf.mxu0 }
 0x24e   :  { %v692_v16 = vadd.f32 %v1198_v6, %v543_v15 }
 0x24f   :  { %v545_v5 = vpop.f32.mrf.mxu0 }
 0x250   :  { %v546_v12 = vadd.f32 %v1179_v0, %v545_v5 }
 0x251   :  { %v547_v7 = vpop.f32.mrf.mxu0 }
 0x252   :  { %v693_v26 = vadd.f32 %v1199_v10, %v546_v12 }
 0x263   :  { %v1218_v14 = vpop.f32.mrf.mxu0 }
 0x264   :  { %v837_v20 = vadd.f32 %v1218_v14, %v692_v16 }
 0x265   :  { %v820_v23 = vpop.f32.mrf.mxu0 }
 0x266   :  { %v982_v24 = vadd.f32 %v1238_v17, %v837_v20  ;;  %v835_v25 = vadd.f32 %v820_v23, %v690_v21 }
 0x267   :  { %v1219_v28 = vpop.f32.mrf.mxu0 }
 0x268   :  { %v993_v30 = vadd.f32 %v1101_v22, %v982_v24  ;;  %v980_v31 = vadd.f32 %v965_v18, %v835_v25  ;;  %v838_v33 = vadd.f32 %v1219_v28, %v693_v26 }
 0x269   :  { %v823_v35 = vpop.f32.mrf.mxu0 }
 0x26a   :  { %v997_v36 = vmax.f32 %v993_v30, 0.0  ;;  %v991_v37 = vadd.f32 %v1101_v22, %v980_v31  ;;  %v983_v38 = vadd.f32 %v1239_v27, %v838_v33  ;;  %v836_v39 = vadd.f32 %v823_v35, %v691_v34 }
 0x26c   :  { %1001 = vst [vmem:[#allocation10 + $0x10] sm:$0xff] %v997_v36  ;;  %v995_v41 = vmax.f32 %v991_v37, 0.0  ;;  %v994_v42 = vadd.f32 %v1101_v22, %v983_v38  ;;  %v981_v43 = vadd.f32 %v968_v40, %v836_v39 }
 0x26e   :  { %999 = vst [vmem:[#allocation10] sm:$0xff] %v995_v41  ;;  %v998_v45 = vmax.f32 %v994_v42, 0.0  ;;  %v992_v46 = vadd.f32 %v1101_v22, %v981_v43 }
 0x270   :  { %1002 = vst [vmem:[#allocation10 + $0x18] sm:$0xff] %v998_v45  ;;  %v996_v47 = vmax.f32 %v992_v46, 0.0 }
 0x272   :  { %1000 = vst [vmem:[#allocation10 + $0x8] sm:$0xff] %v996_v47 }
 0x273   :  { %1392 = shalt.err (!%p1389_p10)
}
 0x274   :  { %s1418_s20 = smov 128   ;;  %s1419_s21 = smov 8  }
 0x275   :  { %1014 = dma.vmem_to_hbm [thread:$0]  %s1009_s18, 512, %s1650_s6, [#allocation4], %s1418_s20, %s1418_s20, %s1419_s21  }
 0x276   :  { %1407 = dma.done.wait [#allocation4], 512  }
 0x277   :  { %1408 = vsyncadd [#allocation4], 4294966784 }
 0x278   :  { %1018 = vsyncpa [#allocation3], 1 }
 0x279   :  { %1019 = vsyncpa [#allocation6], 1 }
 0x27a   :  { %1020 = vsyncpa [#allocation9], 1 }
 0x27b   :  { %1021 = vsyncpa [#allocation4], 1 }

</bundles_post_ra>
